<compile_context>
chip_gen: v7x
topology: tpu7x:2x2x1
jax: 0.10.0
libtpu: 0.0.40
codegen_flags: <defaults>
</compile_context>

<pallas_src>
import functools
import math

import jax
import jax.numpy as jnp
from jax import lax
from jax.experimental import pallas as pl
from jax.experimental.pallas import tpu as pltpu


def _perceiver_attn_kernel(lat_ref, ctx_ref, wq_ref, wk_ref, wv_ref, wo_ref,
                           mask_ref, out_ref, *, num_heads, num_kv_heads,
                           head_dim):
    groups = num_heads // num_kv_heads
    scale = 1.0 / math.sqrt(head_dim)
    in_dt = lat_ref.dtype

    lat = lat_ref[0]                      # (q_len, hidden)
    ctx = ctx_ref[0]                      # (seq,   hidden)
    # K/V see concat([context, latents]); concat is done in VMEM (no extra HBM pass).
    hs = jnp.concatenate([ctx, lat], axis=0)            # (kv_len, hidden)

    # Fused projections: full output width so MXU N >= 128, and K/V are
    # computed once per kv-head instead of once per query head.
    q = jnp.dot(lat, wq_ref[...], preferred_element_type=jnp.float32)   # (q_len, nH*d)
    k = jnp.dot(hs, wk_ref[...], preferred_element_type=jnp.float32)    # (kv_len, nKV*d)
    v = jnp.dot(hs, wv_ref[...], preferred_element_type=jnp.float32)    # (kv_len, nKV*d)

    mask = mask_ref[0, 0]                 # (q_len, kv_len), additive

    # Per-head attention; gather head outputs into one lane-dense slab.
    attn_heads = []
    for h in range(num_heads):
        g = h // groups
        q_h = q[:, h * head_dim:(h + 1) * head_dim].astype(in_dt)
        k_h = k[:, g * head_dim:(g + 1) * head_dim].astype(in_dt)
        v_h = v[:, g * head_dim:(g + 1) * head_dim].astype(in_dt)

        # Contract on the last dim of both operands (MXU consumes transposed
        # RHS directly; no k.T materialization).
        s = lax.dot_general(q_h, k_h, (((1,), (1,)), ((), ())),
                            preferred_element_type=jnp.float32)
        s = s * scale + mask
        # Numerically-stable softmax in f32 (matches torch softmax(dtype=f32)).
        s = s - jnp.max(s, axis=-1, keepdims=True)
        p = jnp.exp(s)
        p = p * pl.reciprocal(jnp.sum(p, axis=-1, keepdims=True), approx=True)

        attn_heads.append(
            jnp.dot(p.astype(in_dt), v_h, preferred_element_type=jnp.float32))

    attn = jnp.concatenate(attn_heads, axis=-1)          # (q_len, nH*d) f32

    # Single output projection with K = num_heads*head_dim; one lane-dense
    # store, accumulation stays in f32 until the final cast.
    out = jnp.dot(attn.astype(in_dt), wo_ref[...],
                  preferred_element_type=jnp.float32)
    out_ref[0] = out.astype(out_ref.dtype)


def idefics2_perceiver_attention(latents, context, wq, wk, wv, wo,
                                 attention_mask, *, num_heads,
                                 num_key_value_heads, head_dim):
    """latents: [B, q_len, H], context: [B, seq, H]
       wq: [H, num_heads*d], wk/wv: [H, num_kv_heads*d], wo: [num_heads*d, H]
       attention_mask: [B, 1, q_len, q_len+seq] additive mask."""
    bsz, q_len, hidden = latents.shape
    seq = context.shape[1]
    kv_len = q_len + seq
    nqd = num_heads * head_dim
    nkd = num_key_value_heads * head_dim
    assert wq.shape == (hidden, nqd)
    assert wk.shape == (hidden, nkd) and wv.shape == (hidden, nkd)
    assert wo.shape == (nqd, hidden)
    assert attention_mask.shape == (bsz, 1, q_len, kv_len)

    kernel = functools.partial(_perceiver_attn_kernel,
                               num_heads=num_heads,
                               num_kv_heads=num_key_value_heads,
                               head_dim=head_dim)

    return pl.pallas_call(
        kernel,
        out_shape=jax.ShapeDtypeStruct((bsz, q_len, hidden), latents.dtype),
        grid_spec=pltpu.PrefetchScalarGridSpec(
            num_scalar_prefetch=0,
            grid=(bsz,),
            in_specs=[
                pl.BlockSpec((1, q_len, hidden), lambda b: (b, 0, 0)),   # latents
                pl.BlockSpec((1, seq, hidden), lambda b: (b, 0, 0)),     # context
                pl.BlockSpec((hidden, nqd), lambda b: (0, 0)),           # wq (natural layout)
                pl.BlockSpec((hidden, nkd), lambda b: (0, 0)),           # wk
                pl.BlockSpec((hidden, nkd), lambda b: (0, 0)),           # wv
                pl.BlockSpec((nqd, hidden), lambda b: (0, 0)),           # wo
                pl.BlockSpec((1, 1, q_len, kv_len), lambda b: (b, 0, 0, 0)),  # mask
            ],
            out_specs=pl.BlockSpec((1, q_len, hidden), lambda b: (b, 0, 0)),
        ),
        compiler_params=pltpu.CompilerParams(
            dimension_semantics=("parallel",),
            vmem_limit_bytes=48 * 1024 * 1024),
    )(latents, context, wq, wk, wv, wo, attention_mask)


def reference(latents, context, wq, wk, wv, wo, mask, *, num_heads,
              num_key_value_heads, head_dim):
    """Pure-JAX reference mirroring the PyTorch forward."""
    bsz, q_len, hidden = latents.shape
    kv_len = q_len + context.shape[1]
    groups = num_heads // num_key_value_heads
    hs = jnp.concatenate([context, latents], axis=1)

    q = (latents @ wq).reshape(bsz, q_len, num_heads, head_dim).transpose(0, 2, 1, 3)
    k = (hs @ wk).reshape(bsz, kv_len, num_key_value_heads, head_dim).transpose(0, 2, 1, 3)
    v = (hs @ wv).reshape(bsz, kv_len, num_key_value_heads, head_dim).transpose(0, 2, 1, 3)
    k = jnp.repeat(k, groups, axis=1)
    v = jnp.repeat(v, groups, axis=1)

    w = jnp.einsum("bhqd,bhkd->bhqk", q, k) / math.sqrt(head_dim) + mask
    w = jax.nn.softmax(w.astype(jnp.float32), axis=-1)
    o = jnp.einsum("bhqk,bhkd->bhqd", w, v)
    o = o.transpose(0, 2, 1, 3).reshape(bsz, q_len, num_heads * head_dim)
    return o @ wo


if __name__ == "__main__":
    # Small, self-consistent config
    bsz = 2
    hidden_size = 64
    num_heads = 4
    head_dim = 32
    num_key_value_heads = 2
    n_latents = 8      # q_len
    seq = 24
    kv_len = n_latents + seq

    key = jax.random.PRNGKey(0)
    k_lat, k_ctx, k_wq, k_wk, k_wv, k_wo, k_mask = jax.random.split(key, 7)

    latents = jax.random.normal(k_lat, (bsz, n_latents, hidden_size), jnp.float32)
    context = jax.random.normal(k_ctx, (bsz, seq, hidden_size), jnp.float32)

    # Deterministic synthetic weights (shapes per module __init__, bias=False)
    scale = 1.0 / math.sqrt(hidden_size)
    wq = jax.random.normal(k_wq, (hidden_size, num_heads * head_dim), jnp.float32) * scale
    wk = jax.random.normal(k_wk, (hidden_size, num_key_value_heads * head_dim), jnp.float32) * scale
    wv = jax.random.normal(k_wv, (hidden_size, num_key_value_heads * head_dim), jnp.float32) * scale
    wo = jax.random.normal(k_wo, (num_heads * head_dim, hidden_size), jnp.float32) * scale

    # Additive attention mask [bsz, 1, q_len, kv_len]; mask a few kv positions.
    mask_bits = jax.random.bernoulli(k_mask, 0.1, (bsz, 1, 1, kv_len))
    attention_mask = jnp.where(mask_bits, -1e9, 0.0).astype(jnp.float32)
    attention_mask = jnp.broadcast_to(attention_mask, (bsz, 1, n_latents, kv_len))

    # --- f32 correctness check ---
    out = idefics2_perceiver_attention(
        latents, context, wq, wk, wv, wo, attention_mask,
        num_heads=num_heads, num_key_value_heads=num_key_value_heads,
        head_dim=head_dim)
    out = jax.block_until_ready(out)

    ref = reference(latents, context, wq, wk, wv, wo, attention_mask,
                    num_heads=num_heads, num_key_value_heads=num_key_value_heads,
                    head_dim=head_dim)
    assert out.shape == (bsz, n_latents, hidden_size)
    # Tolerance accounts for the EUP approximate reciprocal in the softmax.
    assert jnp.allclose(out, ref, atol=1e-2, rtol=1e-2), \
        f"max abs err {jnp.max(jnp.abs(out - ref))}"

    # --- bf16 path (native MXU input format): runs the same kernel in bf16 ---
    out_bf16 = idefics2_perceiver_attention(
        latents.astype(jnp.bfloat16), context.astype(jnp.bfloat16),
        wq.astype(jnp.bfloat16), wk.astype(jnp.bfloat16),
        wv.astype(jnp.bfloat16), wo.astype(jnp.bfloat16),
        attention_mask,
        num_heads=num_heads, num_key_value_heads=num_key_value_heads,
        head_dim=head_dim)
    out_bf16 = jax.block_until_ready(out_bf16)
    assert out_bf16.shape == (bsz, n_latents, hidden_size)
    assert out_bf16.dtype == jnp.bfloat16
    assert bool(jnp.all(jnp.isfinite(out_bf16.astype(jnp.float32))))

    print("KERNEL_OK")
</pallas_src>

<mosaic_0001>
module attributes {stable_mosaic.version = 11 : i64} {
  func.func @_perceiver_attn_kernel(%arg0: i32, %arg1: memref<1x8x64xf32, #tpu.memory_space<vmem>>, %arg2: memref<1x24x64xf32, #tpu.memory_space<vmem>>, %arg3: memref<64x128xf32, #tpu.memory_space<vmem>>, %arg4: memref<64x64xf32, #tpu.memory_space<vmem>>, %arg5: memref<64x64xf32, #tpu.memory_space<vmem>>, %arg6: memref<128x64xf32, #tpu.memory_space<vmem>>, %arg7: memref<1x1x8x32xf32, #tpu.memory_space<vmem>>, %arg8: memref<1x8x64xf32, #tpu.memory_space<vmem>>) attributes {dimension_semantics = [#tpu.dimension_semantics<parallel>], iteration_bounds = array<i64: 2>, scalar_prefetch = 0 : i64, scratch_operands = 0 : i64, tpu.core_type = #tpu.core_type<tc>, window_params = [{transform_indices = @transform_0, window_bounds = array<i64: 1, 8, 64>}, {transform_indices = @transform_1, window_bounds = array<i64: 1, 24, 64>}, {pipeline_mode = #tpu.pipeline_mode<synchronous>, transform_indices = @transform_2, window_bounds = array<i64: 64, 128>}, {pipeline_mode = #tpu.pipeline_mode<synchronous>, transform_indices = @transform_3, window_bounds = array<i64: 64, 64>}, {pipeline_mode = #tpu.pipeline_mode<synchronous>, transform_indices = @transform_4, window_bounds = array<i64: 64, 64>}, {pipeline_mode = #tpu.pipeline_mode<synchronous>, transform_indices = @transform_5, window_bounds = array<i64: 128, 64>}, {transform_indices = @transform_6, window_bounds = array<i64: 1, 1, 8, 32>}, {transform_indices = @transform_7, window_bounds = array<i64: 1, 8, 64>}]} {
    %c0 = arith.constant 0 : index
    %c0_0 = arith.constant 0 : index
    %c0_1 = arith.constant 0 : index
    %0 = vector.load %arg1[%c0, %c0_0, %c0_1] : memref<1x8x64xf32, #tpu.memory_space<vmem>>, vector<1x8x64xf32>
    %1 = vector.shape_cast %0 : vector<1x8x64xf32> to vector<8x64xf32>
    %c0_2 = arith.constant 0 : index
    %c0_3 = arith.constant 0 : index
    %c0_4 = arith.constant 0 : index
    %2 = vector.load %arg2[%c0_2, %c0_3, %c0_4] : memref<1x24x64xf32, #tpu.memory_space<vmem>>, vector<1x24x64xf32>
    %3 = vector.shape_cast %2 : vector<1x24x64xf32> to vector<24x64xf32>
    %4 = tpu.concatenate %3, %1 in 0 : vector<24x64xf32>, vector<8x64xf32> -> vector<32x64xf32>
    %c0_5 = arith.constant 0 : index
    %c0_6 = arith.constant 0 : index
    %5 = vector.load %arg3[%c0_5, %c0_6] : memref<64x128xf32, #tpu.memory_space<vmem>>, vector<64x128xf32>
    %cst = arith.constant dense<0.000000e+00> : vector<8x128xf32>
    %6 = tpu.matmul %1, %5, %cst {dimension_numbers = #tpu.dot_dimension_numbers<[1], [0], [0], [1], [0, 0, 1, 1], [], []>} : vector<8x64xf32>, vector<64x128xf32>, vector<8x128xf32> -> vector<8x128xf32>
    %c0_7 = arith.constant 0 : index
    %c0_8 = arith.constant 0 : index
    %7 = vector.load %arg4[%c0_7, %c0_8] : memref<64x64xf32, #tpu.memory_space<vmem>>, vector<64x64xf32>
    %cst_9 = arith.constant dense<0.000000e+00> : vector<32x64xf32>
    %8 = tpu.matmul %4, %7, %cst_9 {dimension_numbers = #tpu.dot_dimension_numbers<[1], [0], [0], [1], [0, 0, 1, 1], [], []>} : vector<32x64xf32>, vector<64x64xf32>, vector<32x64xf32> -> vector<32x64xf32>
    %c0_10 = arith.constant 0 : index
    %c0_11 = arith.constant 0 : index
    %9 = vector.load %arg5[%c0_10, %c0_11] : memref<64x64xf32, #tpu.memory_space<vmem>>, vector<64x64xf32>
    %cst_12 = arith.constant dense<0.000000e+00> : vector<32x64xf32>
    %10 = tpu.matmul %4, %9, %cst_12 {dimension_numbers = #tpu.dot_dimension_numbers<[1], [0], [0], [1], [0, 0, 1, 1], [], []>} : vector<32x64xf32>, vector<64x64xf32>, vector<32x64xf32> -> vector<32x64xf32>
    %c0_13 = arith.constant 0 : index
    %c0_14 = arith.constant 0 : index
    %c0_15 = arith.constant 0 : index
    %c0_16 = arith.constant 0 : index
    %11 = vector.load %arg7[%c0_13, %c0_14, %c0_15, %c0_16] : memref<1x1x8x32xf32, #tpu.memory_space<vmem>>, vector<1x1x8x32xf32>
    %12 = vector.shape_cast %11 : vector<1x1x8x32xf32> to vector<8x32xf32>
    %13 = vector.extract_strided_slice %6 {offsets = [0, 0], sizes = [8, 32], strides = [1, 1]} : vector<8x128xf32> to vector<8x32xf32>
    %14 = vector.extract_strided_slice %8 {offsets = [0, 0], sizes = [32, 32], strides = [1, 1]} : vector<32x64xf32> to vector<32x32xf32>
    %15 = vector.extract_strided_slice %10 {offsets = [0, 0], sizes = [32, 32], strides = [1, 1]} : vector<32x64xf32> to vector<32x32xf32>
    %cst_17 = arith.constant dense<0.000000e+00> : vector<8x32xf32>
    %16 = tpu.matmul %13, %14, %cst_17 {dimension_numbers = #tpu.dot_dimension_numbers<[1], [1], [0], [0], [0, 0, 1, 0], [], []>} : vector<8x32xf32>, vector<32x32xf32>, vector<8x32xf32> -> vector<8x32xf32>
    %cst_18 = arith.constant 0.176776692 : f32
    %17 = vector.broadcast %cst_18 : f32 to vector<8x32xf32>
    %18 = arith.mulf %16, %17 : vector<8x32xf32>
    %19 = arith.addf %18, %12 : vector<8x32xf32>
    %cst_19 = arith.constant dense<0xFF800000> : vector<8xf32>
    %20 = vector.multi_reduction <maximumf>, %19, %cst_19 [1] : vector<8x32xf32> to vector<8xf32>
    %21 = vector.shape_cast %20 : vector<8xf32> to vector<8x1xf32>
    %22 = vector.broadcast %21 : vector<8x1xf32> to vector<8x32xf32>
    %23 = arith.subf %19, %22 : vector<8x32xf32>
    %24 = math.exp %23 : vector<8x32xf32>
    %cst_20 = arith.constant dense<0.000000e+00> : vector<8xf32>
    %25 = vector.multi_reduction <add>, %24, %cst_20 [1] : vector<8x32xf32> to vector<8xf32>
    %26 = vector.shape_cast %25 : vector<8xf32> to vector<8x1xf32>
    %27 = tpu.reciprocal %26 {approx = true} : vector<8x1xf32> -> vector<8x1xf32>
    %28 = vector.broadcast %27 : vector<8x1xf32> to vector<8x32xf32>
    %29 = arith.mulf %24, %28 : vector<8x32xf32>
    %cst_21 = arith.constant dense<0.000000e+00> : vector<8x32xf32>
    %30 = tpu.matmul %29, %15, %cst_21 {dimension_numbers = #tpu.dot_dimension_numbers<[1], [0], [0], [1], [0, 0, 1, 1], [], []>} : vector<8x32xf32>, vector<32x32xf32>, vector<8x32xf32> -> vector<8x32xf32>
    %31 = vector.extract_strided_slice %6 {offsets = [0, 32], sizes = [8, 32], strides = [1, 1]} : vector<8x128xf32> to vector<8x32xf32>
    %32 = vector.extract_strided_slice %8 {offsets = [0, 0], sizes = [32, 32], strides = [1, 1]} : vector<32x64xf32> to vector<32x32xf32>
    %33 = vector.extract_strided_slice %10 {offsets = [0, 0], sizes = [32, 32], strides = [1, 1]} : vector<32x64xf32> to vector<32x32xf32>
    %cst_22 = arith.constant dense<0.000000e+00> : vector<8x32xf32>
    %34 = tpu.matmul %31, %32, %cst_22 {dimension_numbers = #tpu.dot_dimension_numbers<[1], [1], [0], [0], [0, 0, 1, 0], [], []>} : vector<8x32xf32>, vector<32x32xf32>, vector<8x32xf32> -> vector<8x32xf32>
    %cst_23 = arith.constant 0.176776692 : f32
    %35 = vector.broadcast %cst_23 : f32 to vector<8x32xf32>
    %36 = arith.mulf %34, %35 : vector<8x32xf32>
    %37 = arith.addf %36, %12 : vector<8x32xf32>
    %cst_24 = arith.constant dense<0xFF800000> : vector<8xf32>
    %38 = vector.multi_reduction <maximumf>, %37, %cst_24 [1] : vector<8x32xf32> to vector<8xf32>
    %39 = vector.shape_cast %38 : vector<8xf32> to vector<8x1xf32>
    %40 = vector.broadcast %39 : vector<8x1xf32> to vector<8x32xf32>
    %41 = arith.subf %37, %40 : vector<8x32xf32>
    %42 = math.exp %41 : vector<8x32xf32>
    %cst_25 = arith.constant dense<0.000000e+00> : vector<8xf32>
    %43 = vector.multi_reduction <add>, %42, %cst_25 [1] : vector<8x32xf32> to vector<8xf32>
    %44 = vector.shape_cast %43 : vector<8xf32> to vector<8x1xf32>
    %45 = tpu.reciprocal %44 {approx = true} : vector<8x1xf32> -> vector<8x1xf32>
    %46 = vector.broadcast %45 : vector<8x1xf32> to vector<8x32xf32>
    %47 = arith.mulf %42, %46 : vector<8x32xf32>
    %cst_26 = arith.constant dense<0.000000e+00> : vector<8x32xf32>
    %48 = tpu.matmul %47, %33, %cst_26 {dimension_numbers = #tpu.dot_dimension_numbers<[1], [0], [0], [1], [0, 0, 1, 1], [], []>} : vector<8x32xf32>, vector<32x32xf32>, vector<8x32xf32> -> vector<8x32xf32>
    %49 = vector.extract_strided_slice %6 {offsets = [0, 64], sizes = [8, 32], strides = [1, 1]} : vector<8x128xf32> to vector<8x32xf32>
    %50 = vector.extract_strided_slice %8 {offsets = [0, 32], sizes = [32, 32], strides = [1, 1]} : vector<32x64xf32> to vector<32x32xf32>
    %51 = vector.extract_strided_slice %10 {offsets = [0, 32], sizes = [32, 32], strides = [1, 1]} : vector<32x64xf32> to vector<32x32xf32>
    %cst_27 = arith.constant dense<0.000000e+00> : vector<8x32xf32>
    %52 = tpu.matmul %49, %50, %cst_27 {dimension_numbers = #tpu.dot_dimension_numbers<[1], [1], [0], [0], [0, 0, 1, 0], [], []>} : vector<8x32xf32>, vector<32x32xf32>, vector<8x32xf32> -> vector<8x32xf32>
    %cst_28 = arith.constant 0.176776692 : f32
    %53 = vector.broadcast %cst_28 : f32 to vector<8x32xf32>
    %54 = arith.mulf %52, %53 : vector<8x32xf32>
    %55 = arith.addf %54, %12 : vector<8x32xf32>
    %cst_29 = arith.constant dense<0xFF800000> : vector<8xf32>
    %56 = vector.multi_reduction <maximumf>, %55, %cst_29 [1] : vector<8x32xf32> to vector<8xf32>
    %57 = vector.shape_cast %56 : vector<8xf32> to vector<8x1xf32>
    %58 = vector.broadcast %57 : vector<8x1xf32> to vector<8x32xf32>
    %59 = arith.subf %55, %58 : vector<8x32xf32>
    %60 = math.exp %59 : vector<8x32xf32>
    %cst_30 = arith.constant dense<0.000000e+00> : vector<8xf32>
    %61 = vector.multi_reduction <add>, %60, %cst_30 [1] : vector<8x32xf32> to vector<8xf32>
    %62 = vector.shape_cast %61 : vector<8xf32> to vector<8x1xf32>
    %63 = tpu.reciprocal %62 {approx = true} : vector<8x1xf32> -> vector<8x1xf32>
    %64 = vector.broadcast %63 : vector<8x1xf32> to vector<8x32xf32>
    %65 = arith.mulf %60, %64 : vector<8x32xf32>
    %cst_31 = arith.constant dense<0.000000e+00> : vector<8x32xf32>
    %66 = tpu.matmul %65, %51, %cst_31 {dimension_numbers = #tpu.dot_dimension_numbers<[1], [0], [0], [1], [0, 0, 1, 1], [], []>} : vector<8x32xf32>, vector<32x32xf32>, vector<8x32xf32> -> vector<8x32xf32>
    %67 = vector.extract_strided_slice %6 {offsets = [0, 96], sizes = [8, 32], strides = [1, 1]} : vector<8x128xf32> to vector<8x32xf32>
    %68 = vector.extract_strided_slice %8 {offsets = [0, 32], sizes = [32, 32], strides = [1, 1]} : vector<32x64xf32> to vector<32x32xf32>
    %69 = vector.extract_strided_slice %10 {offsets = [0, 32], sizes = [32, 32], strides = [1, 1]} : vector<32x64xf32> to vector<32x32xf32>
    %cst_32 = arith.constant dense<0.000000e+00> : vector<8x32xf32>
    %70 = tpu.matmul %67, %68, %cst_32 {dimension_numbers = #tpu.dot_dimension_numbers<[1], [1], [0], [0], [0, 0, 1, 0], [], []>} : vector<8x32xf32>, vector<32x32xf32>, vector<8x32xf32> -> vector<8x32xf32>
    %cst_33 = arith.constant 0.176776692 : f32
    %71 = vector.broadcast %cst_33 : f32 to vector<8x32xf32>
    %72 = arith.mulf %70, %71 : vector<8x32xf32>
    %73 = arith.addf %72, %12 : vector<8x32xf32>
    %cst_34 = arith.constant dense<0xFF800000> : vector<8xf32>
    %74 = vector.multi_reduction <maximumf>, %73, %cst_34 [1] : vector<8x32xf32> to vector<8xf32>
    %75 = vector.shape_cast %74 : vector<8xf32> to vector<8x1xf32>
    %76 = vector.broadcast %75 : vector<8x1xf32> to vector<8x32xf32>
    %77 = arith.subf %73, %76 : vector<8x32xf32>
    %78 = math.exp %77 : vector<8x32xf32>
    %cst_35 = arith.constant dense<0.000000e+00> : vector<8xf32>
    %79 = vector.multi_reduction <add>, %78, %cst_35 [1] : vector<8x32xf32> to vector<8xf32>
    %80 = vector.shape_cast %79 : vector<8xf32> to vector<8x1xf32>
    %81 = tpu.reciprocal %80 {approx = true} : vector<8x1xf32> -> vector<8x1xf32>
    %82 = vector.broadcast %81 : vector<8x1xf32> to vector<8x32xf32>
    %83 = arith.mulf %78, %82 : vector<8x32xf32>
    %cst_36 = arith.constant dense<0.000000e+00> : vector<8x32xf32>
    %84 = tpu.matmul %83, %69, %cst_36 {dimension_numbers = #tpu.dot_dimension_numbers<[1], [0], [0], [1], [0, 0, 1, 1], [], []>} : vector<8x32xf32>, vector<32x32xf32>, vector<8x32xf32> -> vector<8x32xf32>
    %85 = tpu.concatenate %30, %48, %66, %84 in 1 : vector<8x32xf32>, vector<8x32xf32>, vector<8x32xf32>, vector<8x32xf32> -> vector<8x128xf32>
    %c0_37 = arith.constant 0 : index
    %c0_38 = arith.constant 0 : index
    %86 = vector.load %arg6[%c0_37, %c0_38] : memref<128x64xf32, #tpu.memory_space<vmem>>, vector<128x64xf32>
    %cst_39 = arith.constant dense<0.000000e+00> : vector<8x64xf32>
    %87 = tpu.matmul %85, %86, %cst_39 {dimension_numbers = #tpu.dot_dimension_numbers<[1], [0], [0], [1], [0, 0, 1, 1], [], []>} : vector<8x128xf32>, vector<128x64xf32>, vector<8x64xf32> -> vector<8x64xf32>
    %c0_40 = arith.constant 0 : index
    %c0_41 = arith.constant 0 : index
    %c0_42 = arith.constant 0 : index
    %88 = vector.load %arg8[%c0_40, %c0_41, %c0_42] : memref<1x8x64xf32, #tpu.memory_space<vmem>>, vector<1x8x64xf32>
    %89 = vector.shape_cast %88 : vector<1x8x64xf32> to vector<8x64xf32>
    %90 = vector.shape_cast %87 : vector<8x64xf32> to vector<1x8x64xf32>
    tpu.vector_store %arg8[%c0_40, %c0_41, %c0_42], %90 {strides = array<i32>} : memref<1x8x64xf32, #tpu.memory_space<vmem>>, vector<1x8x64xf32>,
    return
  }
  func.func @transform_0(%arg0: i32) -> (i32, i32, i32) {
    %c0_i32 = arith.constant 0 : i32
    %c0_i32_0 = arith.constant 0 : i32
    %c0_i32_1 = arith.constant 0 : i32
    return %arg0, %c0_i32, %c0_i32_0 : i32, i32, i32
  }
  func.func @transform_1(%arg0: i32) -> (i32, i32, i32) {
    %c0_i32 = arith.constant 0 : i32
    %c0_i32_0 = arith.constant 0 : i32
    %c0_i32_1 = arith.constant 0 : i32
    return %arg0, %c0_i32, %c0_i32_0 : i32, i32, i32
  }
  func.func @transform_2(%arg0: i32) -> (i32, i32) {
    %c0_i32 = arith.constant 0 : i32
    %c0_i32_0 = arith.constant 0 : i32
    %c0_i32_1 = arith.constant 0 : i32
    return %c0_i32, %c0_i32_0 : i32, i32
  }
  func.func @transform_3(%arg0: i32) -> (i32, i32) {
    %c0_i32 = arith.constant 0 : i32
    %c0_i32_0 = arith.constant 0 : i32
    %c0_i32_1 = arith.constant 0 : i32
    return %c0_i32, %c0_i32_0 : i32, i32
  }
  func.func @transform_4(%arg0: i32) -> (i32, i32) {
    %c0_i32 = arith.constant 0 : i32
    %c0_i32_0 = arith.constant 0 : i32
    %c0_i32_1 = arith.constant 0 : i32
    return %c0_i32, %c0_i32_0 : i32, i32
  }
  func.func @transform_5(%arg0: i32) -> (i32, i32) {
    %c0_i32 = arith.constant 0 : i32
    %c0_i32_0 = arith.constant 0 : i32
    %c0_i32_1 = arith.constant 0 : i32
    return %c0_i32, %c0_i32_0 : i32, i32
  }
  func.func @transform_6(%arg0: i32) -> (i32, i32, i32, i32) {
    %c0_i32 = arith.constant 0 : i32
    %c0_i32_0 = arith.constant 0 : i32
    %c0_i32_1 = arith.constant 0 : i32
    %c0_i32_2 = arith.constant 0 : i32
    return %arg0, %c0_i32, %c0_i32_0, %c0_i32_1 : i32, i32, i32, i32
  }
  func.func @transform_7(%arg0: i32) -> (i32, i32, i32) {
    %c0_i32 = arith.constant 0 : i32
    %c0_i32_0 = arith.constant 0 : i32
    %c0_i32_1 = arith.constant 0 : i32
    return %arg0, %c0_i32, %c0_i32_0 : i32, i32, i32
  }
}

</mosaic_0001>

<bundles_post_ra>
// kernel: tpu_custom_call.1
= control target key start
LH: loop header
LB: loop body
LE: loop exit
PB: predicated region body
PF: predicated region fallthrough
CT: control target
= control target key end

     0   :  { %s2770_s0 = inlined_call_operand.hbm [shape: f32[2,8,64], index: 0, kind: input, shape index: {}]   ;;  %s2771_s1 = inlined_call_operand.hbm [shape: f32[2,24,64], index: 1, kind: input, shape index: {}]   ;;  %s2772_s2 = inlined_call_operand.vmem [shape: f32[64,128], index: 2, kind: input, shape index: {}]   ;;  %s2773_s3 = inlined_call_operand.vmem [shape: f32[64,64], index: 3, kind: input, shape index: {}]   ;;  %s2774_s4 = inlined_call_operand.vmem [shape: f32[64,64], index: 4, kind: input, shape index: {}]   ;;  %s2775_s5 = inlined_call_operand.vmem [shape: f32[128,64], index: 5, kind: input, shape index: {}]   ;;  %s2776_s6 = inlined_call_operand.vmem [shape: f32[2,1,8,32], index: 6, kind: input, shape index: {}]   ;;  %s2777_s7 = inlined_call_operand.hbm [shape: f32[2,8,64], index: 7, kind: output, shape index: {}]  }
   0x1   :  { %2780 = sst [smem:[#allocation11_spill]] %s2770_s0 }
   0x2   :  { %12 = vsyncpa [#allocation3], 0 }
   0x3   :  { %14 = vsyncpa [#allocation3 + $0x1], 0 }
   0x4   :  { %15 = vsyncpa [#allocation6], 0 }
   0x5   :  { %17 = vsyncpa [#allocation6 + $0x1], 0 }
   0x6   :  { %18 = vsyncpa [#allocation4], 0 }
   0x7   :  { %20 = vsyncpa [#allocation4 + $0x1], 0  ;;  %s2267_s24 = smov 0   ;;  %s2269_s25 = smov 0  }
   0x8   :  { %s2271_s26 = smov 0   ;;  %s2273_s27 = smov 0  }
   0x9 LB: > { %s2288_s28 = sadd.s32 4294967295, %s2214_s27   ;;  %s1539_s29 = sadd.s32 4294967294, %s2214_s27   ;;  %s2214_s27 = sphi %s2273_s27, %s2799_s27   ;;  %s2210_s26 = sphi %s2271_s26, %s2798_s26   ;;  %s2206_s25 = sphi %s2269_s25, %s2797_s25   ;;  %s2202_s24 = sphi %s2267_s24, %s2796_s24  }
   0xa   : > { %s2292_s30 = sadd.s32 1, %s2214_s27   ;;  %s33_s8 = sadd.s32 1, %s2210_s26 }
   0xb   : > { %s30_s9 = ssub.s32 %s2214_s27, %s2292_s30  ;;  %p40_p0 = scmp.ne.s32.totalorder %s2210_s26, %s2206_s25 }
   0xc   : > { %p31_p1 = scmp.eq.s32.totalorder %s30_s9, 0  ;;  %p41_p2 = scmp.eq.s32.totalorder %s2214_s27, 0 }
   0xd   : > { %p46_p3 = scmp.ne.s32.totalorder %s2206_s25, %s2202_s24  ;;  %p47_p4 = scmp.eq.s32.totalorder %s2288_s28, 0 }
   0xe   : > { %s2304_s10 = scalar_select %p31_p1, %s2210_s26, %s33_s8  }
   0xf   : > { %p2306_p5 = por %p41_p2, %p40_p0  ;;  %p2310_p6 = por %p47_p4, %p46_p3 }
  0x10   : > { %p206_p7 = scmp.eq.s32.totalorder %s2288_s28, 1  ;;  %p212_p8 = scmp.eq.s32.totalorder %s1539_s29, 1 }
  0x11   : > { %s2782_s12 = scalar_select %p2310_p6, 1, 0 }
  0x12   : > { %p2006_p10 = scmp.lt.s32.totalorder %s2214_s27, 2  ;;  %p2317_p11 = por %p206_p7, %p40_p0 }
  0x13   : > { %p2321_p12 = por %p212_p8, %p46_p3  ;;  %s2326_s15 = sand.u32 1, %s2210_s26  }
  0x14   : > { %s2783_s13 = scalar_select %p2317_p11, 1, 0 }
  0x15   : > { %s2784_s14 = scalar_select %p2321_p12, 1, 0 }
  0x16   : > { %s1543_s16 = sshll.u32 %s2214_s27, 7  ;;  %s1542_s17 = sshll.u32 %s2326_s15, 3 }
  0x17   : > { %s2785_s0 = sld [smem:[#allocation11_spill]]  ;;  %s248_s21 = scalar_lea.vmem [#allocation2], %s1542_s17 }
  0x18   : > { %s255_s22 = sshll.u32 %s248_s21, 4  ;;  %p2337_p13 = pnand %p2006_p10, %p2306_p5  ;;  %s2341_s22 = int_to_ptr.vmem [resolvable:$true] %s255_s22 }
  0x19   : > { %s245_s29 = scalar_lea.sflag [#allocation3], %s2326_s15 }
  0x1a   : > { %p2086_p3 = pneg %p2337_p13 }
  0x1d   : > { %s2333_s20 = scalar_lea.hbm %s2785_s0, %s1543_s16  ;;  %s2089_s16 = scalar_lea.hbm %s2785_s0, 256 }
  0x1e   : > { %s2084_s8 = scalar_lea.hbm %s2333_s20, 128  ;;  %p2090_p5 = scmp.lt.u32.totalorder %s2333_s20, %s2785_s0 }
  0x1f   : > { %p2085_p2 = scmp.ne.s32.totalorder %s2333_s20, %s2084_s8  ;;  %p2091_p8 = scmp.lt.u32.totalorder %s2089_s16, %s2084_s8 }
  0x20   : > { %p2093_p9 = scmp.lt.u32.totalorder %s2084_s8, %s2333_s20 }
  0x21   : > { %p2087_p4 = pnand %p2086_p3, %p2085_p2  ;;  %p2092_p10 = por %p2091_p8, %p2090_p5 }
  0x23   : > { %p2088_p7 = pneg %p2087_p4  ;;  %p2094_p0 = por %p2093_p9, %p2092_p10 }
  0x25   : > { %p2095_p1 = pnand %p2094_p0, %p2088_p7 }
  0x27   : > { %2098 = shalt.err (!%p2095_p1)
}
  0x28   : > { %s2099_s19 = scalar_lea.vmem %s2341_s22, 128  ;;  %s2216_s21 = smov [#allocation2]  }
  0x29   : > { %p2100_p2 = scmp.ne.s32.totalorder %s2341_s22, %s2099_s19  ;;  %s2104_s9 = sshll.u32 %s2216_s21, 4  ;;  %s2105_s9 = int_to_ptr.vmem [resolvable:$false] %s2104_s9 }
  0x2a   : > { %s2106_s11 = scalar_lea.vmem %s2105_s9, 256  ;;  %p2107_p11 = scmp.lt.s32.totalorder %s2341_s22, %s2105_s9 }
  0x2b   : > { %p2102_p4 = pnand %p2100_p2, %p2086_p3  ;;  %p2108_p5 = scmp.lt.s32.totalorder %s2106_s11, %s2099_s19 }
  0x2d   : > { %p2103_p12 = pneg %p2102_p4  ;;  %p2109_p8 = por %p2108_p5, %p2107_p11 }
  0x2f   : > { %p2110_p9 = pnand %p2109_p8, %p2103_p12 }
  0x31   : > { %2113 = shalt.err (!%p2110_p9)
}
  0x32   : > { %1998 = dma.hbm_to_vmem [thread:$0]  (!%p2337_p13), %s2333_s20, 128, %s2341_s22, %s245_s29  }
  0x33   : > { %p2787_p0 = scmp.lt.s32.totalorder %s2214_s27, 3  ;;  %p2788_p1 = scmp.ge.s32.totalorder %s2214_s27, 1 }
  0x34   : > { %s1986_s16 = smul.u32 24, %s2326_s15  ;;  %s263_s20 = scalar_lea.sflag [#allocation6], %s2326_s15 }
  0x35   : > { %p2375_p7 = pnand %p2788_p1, %p2787_p0  ;;  %s1987_s17 = smul.u32 384, %s2214_s27 }
  0x36   : > { %s266_s9 = scalar_lea.vmem [#allocation5], %s1986_s16 }
  0x37   : > { %s2384_s21 = scalar_lea.hbm %s2771_s1, %s1987_s17  ;;  %s273_s11 = sshll.u32 %s266_s9, 4  ;;  %s2386_s11 = int_to_ptr.vmem [resolvable:$true] %s273_s11 }
  0x38   : > { %s2114_s22 = scalar_lea.hbm %s2384_s21, 384  ;;  %s2119_s17 = scalar_lea.hbm %s2771_s1, 768 }
  0x39   : > { %p2115_p11 = scmp.ne.s32.totalorder %s2384_s21, %s2114_s22  ;;  %p2120_p2 = scmp.lt.u32.totalorder %s2384_s21, %s2771_s1 }
  0x3a   : > { %p2121_p4 = scmp.lt.u32.totalorder %s2119_s17, %s2114_s22  ;;  %p2123_p8 = scmp.lt.u32.totalorder %s2114_s22, %s2384_s21 }
  0x3b   : > { %p2117_p12 = pnand %p2115_p11, %p2086_p3 }
  0x3c   : > { %p2122_p5 = por %p2121_p4, %p2120_p2 }
  0x3d   : > { %p2118_p10 = pneg %p2117_p12 }
  0x3e   : > { %p2124_p9 = por %p2123_p8, %p2122_p5 }
  0x40   : > { %p2125_p0 = pnand %p2124_p9, %p2118_p10 }
  0x42   : > { %2128 = shalt.err (!%p2125_p0)
}
  0x43   : > { %s2129_s16 = scalar_lea.vmem %s2386_s11, 384  ;;  %s2217_s0 = smov [#allocation5]  }
  0x44   : > { %p2130_p1 = scmp.ne.s32.totalorder %s2386_s11, %s2129_s16  ;;  %s2134_s9 = sshll.u32 %s2217_s0, 4  ;;  %s2135_s9 = int_to_ptr.vmem [resolvable:$false] %s2134_s9 }
  0x45   : > { %s2136_s29 = scalar_lea.vmem %s2135_s9, 768  ;;  %p2137_p6 = scmp.lt.s32.totalorder %s2386_s11, %s2135_s9 }
  0x46   : > { %p2132_p11 = pnand %p2130_p1, %p2086_p3  ;;  %p2138_p2 = scmp.lt.s32.totalorder %s2136_s29, %s2129_s16 }
  0x48   : > { %p2133_p12 = pneg %p2132_p11  ;;  %p2139_p4 = por %p2138_p2, %p2137_p6 }
  0x4a   : > { %p2140_p5 = pnand %p2139_p4, %p2133_p12 }
  0x4c   : > { %2143 = shalt.err (!%p2140_p5)
}
  0x4d   : > { %s2218_s22 = smov 128   ;;  %s2219_s17 = smov 8  }
  0x4e   : > { %2001 = dma.hbm_to_vmem [thread:$0]  (!%p2337_p13), %s2384_s21, 384, %s2386_s11, %s263_s20, %s2218_s22, %s2218_s22, %s2219_s17  }
  0x4f   : > { %292 = sbr.rel (%p2375_p7) target bundleno = 2612 (0xa34), region = 48  ;;  %s2417_s18 = sand.u32 (!%p2375_p7), 1, %s2206_s25  }
  0x50   : > { %s1546_s19 = sshll.u32 (!%p2375_p7), %s2417_s18, 3  ;;  %s295_s16 = scalar_lea.sflag (!%p2375_p7), [#allocation3], %s2417_s18 }
  0x51   : > { %s2423_s0 = scalar_lea.vmem (!%p2375_p7), [#allocation2], %s1546_s19  ;;  %p2790_p6 = scmp.ne.s32.totalorder (!%p2375_p7), %s2782_s12, 0 }
  0x56   : > { %2189 = dma.done.wait (%p2790_p6), %s295_s16, 128  }
  0x57   : > { %2191 = vsyncadd (%p2790_p6), %s295_s16, 4294967168  ;;  %s1988_s15 = smul.u32 24, %s2417_s18  ;;  %s304_s23 = scalar_lea.sflag [#allocation6], %s2417_s18 }
  0x59   : > { %s2431_s8 = scalar_lea.vmem [#allocation5], %s1988_s15 }
  0x5a   : > { %2193 = dma.done.wait (%p2790_p6), %s304_s23, 384  }
  0x5b   : > { %2195 = vsyncadd (%p2790_p6), %s304_s23, 4294966912  ;;  %v2220_v0 = vmov 0.0|0.0   ;;  %vm2221_vm0 = vmmov 0   ;;  %v2222_v1 = vmov 0.0   ;;  %v355_v2 = vld [vmem:[%s2772_s2] sm:$0xff]  ;;  %v356_v3 = vld [vmem:[%s2772_s2 + $0x8] sm:$0xff] }
  0x5c   : > { %1862 = vmatprep.subr.bf16.mxu1 %v2220_v0  ;;  %1692 = vmatprep.mubr.msk.f32.mxu1 %vm2221_vm0, %v2222_v1  ;;  %v357_v4 = vld [vmem:[%s2772_s2 + $0x10] sm:$0xff]  ;;  %v1863_v5 = vpack.c.bf16 %v356_v3, %v355_v2  ;;  %v358_v6 = vld [vmem:[%s2772_s2 + $0x18] sm:$0xff]  ;;  %v359_v8 = vld [vmem:[%s2772_s2 + $0x20] sm:$0xff]  ;;  %vm363_vm1 = vcmask 523264   ;;  %s2223_s15 = smov 96   ;;  %vm633_vm2 = vcmask 261120  }
  0x5d   : > { %v1866_v7 = vpack.c.bf16 %v358_v6, %v357_v4  ;;  %v360_v9 = vld [vmem:[%s2772_s2 + $0x28] sm:$0xff]  ;;  %v361_v12 = vld [vmem:[%s2772_s2 + $0x30] sm:$0xff]  ;;  %v362_v13 = vld [vmem:[%s2772_s2 + $0x38] sm:$0xff]  ;;  %p347_p13 = scmp.lt.s32.totalorder %s2288_s28, 1  ;;  %s2224_s22 = smov 64   ;;  %vm1331_vm4 = vcmask 785408  }
  0x5e   : > { %1864 = vmatpush3.bf16.msra.mxu1 %v1863_v5  ;;  %v352_v10 = vld [vmem:[%s2431_s8] sm:$0xff]  ;;  %v1869_v11 = vpack.c.bf16 %v360_v9, %v359_v8  ;;  %v437_v14 = vld [vmem:[%s2773_s3] sm:$0xff]  ;;  %v1872_v16 = vpack.c.bf16 %v362_v13, %v361_v12  ;;  %v440_v19 = vld [vmem:[%s2773_s3 + $0x18] sm:$0xff]  ;;  %s2225_s17 = smov 32   ;;  %s1583_s12 = sshll.u32 %s2288_s28, 7 }
  0x5f   : > { %1865 = vmatprep.subr.bf16.mxu1 %v2220_v0  ;;  %1733 = vmatprep.mubr.msk.f32.mxu0 %vm363_vm1, %v352_v10  ;;  %v438_v15 = vld [vmem:[%s2773_s3 + $0x8] sm:$0xff]  ;;  %v439_v18 = vld [vmem:[%s2773_s3 + $0x10] sm:$0xff]  ;;  %v441_v22 = vld [vmem:[%s2773_s3 + $0x20] sm:$0xff]  ;;  %s348_s20 = scalar_select %p347_p13, %s2288_s28, 1 }
  0x60   : > { %v1874_v17 = vpack.c.bf16 %v438_v15, %v437_v14  ;;  %v2482_v20 = vld [vmem:[%s2423_s0] sm:$0xff]  ;;  %v1878_v21 = vpack.c.bf16 %v440_v19, %v439_v18  ;;  %v443_v25 = vld [vmem:[%s2773_s3 + $0x30] sm:$0xff]  ;;  %v444_v26 = vld [vmem:[%s2773_s3 + $0x38] sm:$0xff]  ;;  %s2725_s16 = scalar_lea.hbm %s2777_s7, %s1583_s12  ;;  %p2793_p7 = scmp.ne.s32.totalorder %s2783_s13, 0 }
  0x61   : > { %v442_v23 = vld [vmem:[%s2773_s3 + $0x28] sm:$0xff]  ;;  %v1886_v27 = vpack.c.bf16 %v444_v26, %v443_v25  ;;  %v353_v28 = vld [vmem:[%s2431_s8 + $0x8] sm:$0xff]  ;;  %v354_v29 = vld [vmem:[%s2431_s8 + $0x10] sm:$0xff]  ;;  %s1548_s9 = sshll.u32 %s348_s20, 3  ;;  %s1421_s8 = scalar_lea.sflag [#allocation4], %s2417_s18 }
  0x62   : > { %1867 = vmatpush3.bf16.msra.mxu1 %v1866_v7  ;;  %v1882_v24 = vpack.c.bf16 %v442_v23, %v441_v22  ;;  %vm2518_vm3 = vmpackc.low %vm633_vm2, %vm633_vm2  ;;  %v539_v42 = vld [vmem:[%s2774_s4] sm:$0xff]  ;;  %v540_v43 = vld [vmem:[%s2774_s4 + $0x8] sm:$0xff]  ;;  %s350_s0 = scalar_lea.vmem %s2776_s6, %s1548_s9  ;;  %s2226_s28 = smov [#allocation7]  }
  0x63   : > { %1868 = vmatprep.subr.bf16.mxu1 %v2220_v0  ;;  %v1890_v44 = vpack.c.bf16 %v540_v43, %v539_v42  ;;  %v541_v45 = vld [vmem:[%s2774_s4 + $0x10] sm:$0xff]  ;;  %v542_v46 = vld [vmem:[%s2774_s4 + $0x18] sm:$0xff]  ;;  %v543_v48 = vld [vmem:[%s2774_s4 + $0x20] sm:$0xff] }
  0x64   : > { %v1894_v47 = vpack.c.bf16 %v542_v46, %v541_v45  ;;  %v544_v49 = vld [vmem:[%s2774_s4 + $0x28] sm:$0xff]  ;;  %v545_v51 = vld [vmem:[%s2774_s4 + $0x30] sm:$0xff]  ;;  %v546_v52 = vld [vmem:[%s2774_s4 + $0x38] sm:$0xff] }
  0x65   : > { %1891 = vmatprep.subr.bf16.mxu0 %v1890_v44  ;;  %v1898_v50 = vpack.c.bf16 %v544_v49, %v543_v48  ;;  %v1902_v53 = vpack.c.bf16 %v546_v52, %v545_v51  ;;  %v2589_v55 = vld [vmem:[%s350_s0] sm:$0xff]  ;;  %s346_s0 = scalar_lea.vmem [#allocation7], %s1546_s19  ;;  %s2148_s19 = sshll.u32 %s2226_s28, 4  ;;  %s2149_s19 = int_to_ptr.vmem [resolvable:$false] %s2148_s19 }
  0x66   : > { %1870 = vmatpush3.bf16.msra.mxu1 %v1869_v11  ;;  %1893 = vmatpush3.bf16.msra.mxu0 %v1890_v44  ;;  %s2150_s21 = scalar_lea.vmem %s2149_s19, 256 }
  0x67   : > { %1871 = vmatprep.subr.bf16.mxu1 %v2220_v0  ;;  %1895 = vmatprep.subr.bf16.mxu0 %v1894_v47 }
  0x6a   : > { %1873 = vmatpush3.bf16.msra.mxu1 %v1872_v16  ;;  %1897 = vmatpush3.bf16.msra.mxu0 %v1894_v47 }
  0x6b   : > { %1875 = vmatprep.subr.bf16.mxu1 %v1874_v17  ;;  %1899 = vmatprep.subr.bf16.mxu0 %v1898_v50 }
  0x6d   : > { %1693 = vmatmul.mubr.msk.f32.vlgmr.msra.gmra.mrb[0].mxu1 %vm363_vm1, %v2482_v20 }
  0x6e   : > { %1877 = vmatpush3.bf16.msra.mxu1 %v1874_v17  ;;  %1711 = vmatprep.mubr.msk.f32.mxu1 %vm363_vm1, %v352_v10 }
  0x6f   : > { %1879 = vmatprep.subr.bf16.mxu1 %v1878_v21  ;;  %1901 = vmatpush3.bf16.msra.mxu0 %v1898_v50 }
  0x70   : > { %1903 = vmatprep.subr.bf16.mxu0 %v1902_v53 }
  0x72   : > { %1881 = vmatpush3.bf16.msra.mxu1 %v1878_v21 }
  0x73   : > { %1883 = vmatprep.subr.bf16.mxu1 %v1882_v24  ;;  %1905 = vmatpush3.bf16.msra.mxu0 %v1902_v53 }
  0x74   : > { %1914 = vmatprep.subr.bf16.mxu0 %v2220_v0 }
  0x76   : > { %1885 = vmatpush3.bf16.msra.mxu1 %v1882_v24  ;;  %1734 = vmatmul.mubr.msk.f32.vlgmr.msra.gmra.mrb[0].mxu0 %vm363_vm1, %v353_v28 }
  0x77   : > { %1887 = vmatprep.subr.bf16.mxu1 %v1886_v27  ;;  %1736 = vmatprep.mubr.msk.f32.mxu0 %vm363_vm1, %v354_v29 }
  0x7a   : > { %1889 = vmatpush3.bf16.msra.mxu1 %v1886_v27  ;;  %1737 = vmatmul.mubr.msk.f32.gmra.mrb[2].mxu0 %vm363_vm1, %v2482_v20 }
  0x7b   : > { %1906 = vmatprep.subr.bf16.mxu1 %v2220_v0  ;;  %1758 = vmatprep.mubr.msk.f32.mxu0 %vm2221_vm0, %v2222_v1 }
  0x7d   : > { %1712 = vmatmul.mubr.msk.f32.vlgmr.msra.gmra.mrb[2].mxu1 %vm363_vm1, %v353_v28 }
  0x7e   : > { %1714 = vmatprep.mubr.msk.f32.mxu1 %vm363_vm1, %v354_v29 }
  0x81   : > { %1715 = vmatmul.mubr.msk.f32.gmra.mrb[4].mxu1 %vm363_vm1, %v2482_v20 }
  0x82   : > { %1747 = vmatprep.mubr.msk.f32.mxu1 %vm2221_vm0, %v2222_v1 }
 0x140   : > { %v2508_v30 = vpop.f32.mrb[0].mxu1 }
 0x141   : > { %805 = vrot.lane.b32.xlu0 %v2508_v30, %s2223_s15  ;;  %v1694_v31 = vpop.f32.mrb[1].mxu1 }
 0x149   : > { %v2596_v8 = vpop.f32.mrb[0].mxu0 }
 0x14a   : > { %v613_v9 = vpop.f32.mrb[1].mxu0 }
 0x14b   : > { %v1915_v10 = vpack.c.bf16 %v2596_v8, %v613_v9  ;;  %v2058_v14 = vpack.i.bf16 %v2596_v8, %v613_v9 }
 0x14d   : > { %v1738_v11 = vpop.f32.mrb[2].mxu0  ;;  %1916 = vmatpush3.bf16.msra.mxu0 %v1915_v10 }
 0x14e   : > { %v623_v12 = vpop.f32.mrb[3].mxu0  ;;  %1917 = vmatprep.subr.bf16.mxu0 %v2220_v0 }
 0x14f   : > { %v1918_v13 = vpack.c.bf16 %v1738_v11, %v623_v12  ;;  %v2063_v15 = vpack.i.bf16 %v1738_v11, %v623_v12 }
 0x150   : > { %v2512_v32 = vpop.f32.mrb[2].mxu1 }
 0x151   : > { %v2514_v33 = vpop.f32.mrb[3].mxu1  ;;  %1919 = vmatpush3.bf16.msra.mxu0 %v1918_v13 }
 0x152   : > { %v2048_v35 = vpack.i.bf16 %v2512_v32, %v2514_v33  ;;  %v1907_v36 = vpack.c.bf16 %v2512_v32, %v2514_v33  ;;  %1928 = vmatprep.subr.bf16.mxu0 %v2220_v0 }
 0x154   : > { %1909 = vmatpush3.bf16.xpose.msk.msra.mxu1 %vm2518_vm3, %v1907_v36  ;;  %v2528_v37 = vpop.f32.mrb[4].mxu1 }
 0x155   : > { %v2530_v38 = vpop.f32.mrb[5].mxu1  ;;  %1910 = vmatprep.subr.bf16.mxu1 %v2220_v0 }
 0x156   : > { %v2053_v39 = vpack.i.bf16 %v2528_v37, %v2530_v38  ;;  %v1911_v40 = vpack.c.bf16 %v2528_v37, %v2530_v38 }
 0x15c   : > { %1913 = vmatpush3.bf16.xpose.msk.msra.mxu1 %vm2518_vm3, %v1911_v40 }
 0x15d   : > { %1920 = vmatprep.subr.bf16.mxu1 %v2220_v0 }
 0x163   : > { %1748 = vmatmul.mubr.msk.f32.vlgmr.msra.gmra.mrb[6].mxu1 %vm633_vm2, %v2508_v30 }
 0x164   : > { %1923 = vmatpush3.bf16.xpose.msk.msra.mxu1 %vm2518_vm3, %v1907_v36  ;;  %1769 = vmatprep.mubr.msk.f32.mxu1 %vm2221_vm0, %v2222_v1 }
 0x165   : > { %1924 = vmatprep.subr.bf16.mxu1 %v2220_v0 }
 0x16c   : > { %1927 = vmatpush3.bf16.xpose.msk.msra.mxu1 %vm2518_vm3, %v1911_v40 }
 0x16d   : > { %1942 = vmatprep.subr.bf16.mxu1 %v2220_v0 }
 0x1b3   : > { %v806_v41 = vpop.permute.xlu0 %805 }
 0x1b4   : > { %1770 = vmatmul.mubr.msk.f32.vlgmr.msra.gmra.mrb[8].mxu1 %vm633_vm2, %v806_v41 }
 0x1b5   : > { %1802 = vmatprep.mubr.msk.f32.mxu1 %vm2221_vm0, %v2222_v1 }
 0x236   : > { %v715_v54 = vpop.f32.mrb[6].mxu1 }
 0x237   : > { %v719_v56 = vmul.f32 0.17677669, %v715_v54  ;;  %v1749_v57 = vpop.f32.mrb[7].mxu1 }
 0x239   : > { %v720_v58 = vadd.f32 %v719_v56, %v2589_v55 }
 0x23b   : > { %v721_v59 = vsel %vm633_vm2, %v720_v58, -inf }
 0x23c   : > { %722 = vmax.xlane.f32.xlu0 %v721_v59 }
 0x287   : > { %v875_v60 = vpop.f32.mrb[8].mxu1 }
 0x288   : > { %v879_v61 = vmul.f32 0.17677669, %v875_v60  ;;  %v1771_v62 = vpop.f32.mrb[9].mxu1 }
 0x28a   : > { %v880_v63 = vadd.f32 %v879_v61, %v2589_v55 }
 0x28c   : > { %v881_v2 = vsel %vm633_vm2, %v880_v63, -inf }
 0x28d   : > { %882 = vmax.xlane.f32.xlu1 %v881_v2 }
 0x2c9   : > { %v723_v3 = vpop.xlane.xlu0 %722 }
 0x2ca   : > { %v724_v4 = vsub.f32 %v720_v58, %v723_v3 }
 0x2cc   : > { %v725_v5 = vmul.f32 1.442695, %v724_v4 }
 0x2ce   : > { %2068 = vpow2.f32 %v725_v5 }
 0x2d8   : > { %v2069_v6 = vpop.eup %2068 }
 0x2d9   : > { %v727_v7 = vsel %vm633_vm2, %v2069_v6, 0.0 }
 0x2da   : > { %728 = vadd.xlane.f32.xlu1 %v727_v7 }
 0x2eb   : > { %2049 = vrot.lane.b32.xlu1 %v2048_v35, %s2223_s15 }
 0x31a   : > { %v883_v16 = vpop.xlane.xlu1 %882 }
 0x31b   : > { %v884_v17 = vsub.f32 %v880_v63, %v883_v16  ;;  %v1334_v16 = vld [vmem:[%s2775_s5 + $0x8] sm:$0xff] }
 0x31d   : > { %v885_v18 = vmul.f32 1.442695, %v884_v17  ;;  %v1335_v17 = vld [vmem:[%s2775_s5 + $0x10] sm:$0xff] }
 0x31f   : > { %2070 = vpow2.f32 %v885_v18 }
 0x329   : > { %v2071_v19 = vpop.eup %2070 }
 0x32a   : > { %v887_v20 = vsel %vm633_vm2, %v2071_v19, 0.0 }
 0x32b   : > { %888 = vadd.xlane.f32.xlu1 %v887_v20 }
 0x33c   : > { %2054 = vrot.lane.b32.xlu1 %v2053_v39, %s2223_s15 }
 0x340   : > { %965 = vrot.lane.b32.xlu1 %v2508_v30, %s2224_s22 }
 0x367   : > { %v729_v21 = vpop.xlane.xlu1 %728 }
 0x368   : > { %2072 = vrcp.f32 %v729_v21  ;;  %v1338_v21 = vld [vmem:[%s2775_s5 + $0x28] sm:$0xff] }
 0x36b   : > { %v2050_v24 = vpop.permute.xlu1 %2049 }
 0x36c   : > { %v2052_v26 = vunpack.i.h.bf16 %v2050_v24  ;;  %v2051_v27 = vunpack.i.l.bf16 %v2050_v24  ;;  %v1340_v24 = vld [vmem:[%s2775_s5 + $0x38] sm:$0xff] }
 0x36e   : > { %v1935_v31 = vpack.c.bf16 %v2052_v26, %v2051_v27  ;;  %v1341_v26 = vld [vmem:[%s2775_s5 + $0x40] sm:$0xff]  ;;  %v1342_v27 = vld [vmem:[%s2775_s5 + $0x48] sm:$0xff] }
 0x372   : > { %v2073_v22 = vpop.eup %2072 }
 0x373   : > { %v731_v23 = vmul.f32 %v2073_v22, %v2069_v6 }
 0x375   : > { %1759 = vmatmul.mubr.msk.f32.vlgmr.msra.gmra.mrb[4].mxu0 %vm633_vm2, %v731_v23  ;;  %v1339_v23 = vld [vmem:[%s2775_s5 + $0x30] sm:$0xff] }
 0x376   : > { %1930 = vmatpush3.bf16.msra.mxu0 %v1915_v10  ;;  %1780 = vmatprep.mubr.msk.f32.mxu0 %vm2221_vm0, %v2222_v1 }
 0x377   : > { %1931 = vmatprep.subr.bf16.mxu0 %v2220_v0 }
 0x37a   : > { %1933 = vmatpush3.bf16.msra.mxu0 %v1918_v13 }
 0x37b   : > { %1934 = vmatprep.subr.bf16.mxu0 %v2220_v0 }
 0x3b8   : > { %v889_v25 = vpop.xlane.xlu1 %888 }
 0x3b9   : > { %2074 = vrcp.f32 %v889_v25  ;;  %v1972_v25 = vpack.c.bf16 %v1340_v24, %v1339_v23 }
 0x3bc   : > { %v2055_v32 = vpop.permute.xlu1 %2054 }
 0x3bd   : > { %v2057_v33 = vunpack.i.h.bf16 %v2055_v32  ;;  %v2056_v35 = vunpack.i.l.bf16 %v2055_v32 }
 0x3bf   : > { %v1939_v36 = vpack.c.bf16 %v2057_v33, %v2056_v35  ;;  %v1345_v33 = vld [vmem:[%s2775_s5 + $0x60] sm:$0xff]  ;;  %v1346_v35 = vld [vmem:[%s2775_s5 + $0x68] sm:$0xff] }
 0x3c0   : > { %v966_v37 = vpop.permute.xlu1 %965 }
 0x3c3   : > { %v2075_v28 = vpop.eup %2074 }
 0x3c4   : > { %v891_v29 = vmul.f32 %v2075_v28, %v2071_v19  ;;  %v1336_v19 = vld [vmem:[%s2775_s5 + $0x18] sm:$0xff]  ;;  %v1975_v28 = vpack.c.bf16 %v1342_v27, %v1341_v26 }
 0x3c5   : > { %v1966_v20 = vpack.c.bf16 %v1336_v19, %v1335_v17 }
 0x3c6   : > { %1781 = vmatmul.mubr.msk.f32.vlgmr.msra.gmra.mrb[6].mxu0 %vm633_vm2, %v891_v29  ;;  %v1343_v29 = vld [vmem:[%s2775_s5 + $0x50] sm:$0xff] }
 0x3c7   : > { %1937 = vmatpush3.bf16.xpose.msk.msra.mxu0 %vm2518_vm3, %v1935_v31  ;;  %1791 = vmatprep.mubr.msk.f32.mxu0 %vm2221_vm0, %v2222_v1 }
 0x3c8   : > { %1938 = vmatprep.subr.bf16.mxu0 %v2220_v0 }
 0x3cf   : > { %1941 = vmatpush3.bf16.xpose.msk.msra.mxu0 %vm2518_vm3, %v1939_v36 }
 0x3d0   : > { %1956 = vmatprep.subr.bf16.mxu0 %v2220_v0 }
 0x3d6   : > { %1792 = vmatmul.mubr.msk.f32.vlgmr.msra.gmra.mrb[8].mxu0 %vm633_vm2, %v966_v37  ;;  %v1347_v37 = vld [vmem:[%s2775_s5 + $0x70] sm:$0xff] }
 0x3d7   : > { %1824 = vmatprep.mubr.msk.f32.mxu0 %vm2221_vm0, %v2222_v1 }
 0x448   : > { %v2630_v38 = vpop.f32.mrb[4].mxu0 }
 0x449   : > { %v1760_v39 = vpop.f32.mrb[5].mxu0 }
 0x44a   : > { %v1348_v39 = vld [vmem:[%s2775_s5 + $0x78] sm:$0xff] }
 0x499   : > { %v961_v40 = vpop.f32.mrb[6].mxu0 }
 0x49a   : > { %v1782_v41 = vpop.f32.mrb[7].mxu0 }
 0x4a9   : > { %v1051_v42 = vpop.f32.mrb[8].mxu0 }
 0x4aa   : > { %v1055_v43 = vmul.f32 0.17677669, %v1051_v42  ;;  %v1793_v44 = vpop.f32.mrb[9].mxu0 }
 0x4ac   : > { %v1056_v45 = vadd.f32 %v1055_v43, %v2589_v55 }
 0x4ae   : > { %v1057_v46 = vsel %vm633_vm2, %v1056_v45, -inf }
 0x4af   : > { %1058 = vmax.xlane.f32.xlu0 %v1057_v46 }
 0x4c5   : > { %2059 = vrot.lane.b32.xlu0 %v2058_v14, %s2223_s15 }
 0x4c9   : > { %2064 = vrot.lane.b32.xlu0 %v2063_v15, %s2223_s15 }
 0x4cd   : > { %1157 = vrot.lane.b32.xlu0 %v2508_v30, %s2225_s17 }
 0x53c   : > { %v1059_v47 = vpop.xlane.xlu0 %1058 }
 0x53d   : > { %v1060_v48 = vsub.f32 %v1056_v45, %v1059_v47 }
 0x53f   : > { %v1061_v49 = vmul.f32 1.442695, %v1060_v48 }
 0x540   : > { %v2060_v50 = vpop.permute.xlu0 %2059 }
 0x541   : > { %2076 = vpow2.f32 %v1061_v49  ;;  %v2062_v51 = vunpack.i.h.bf16 %v2060_v50  ;;  %v2061_v52 = vunpack.i.l.bf16 %v2060_v50 }
 0x543   : > { %v1943_v53 = vpack.c.bf16 %v2062_v51, %v2061_v52 }
 0x544   : > { %v2065_v54 = vpop.permute.xlu0 %2064 }
 0x545   : > { %v2067_v56 = vunpack.i.h.bf16 %v2065_v54  ;;  %v2066_v57 = vunpack.i.l.bf16 %v2065_v54  ;;  %1944 = vmatpush3.bf16.msra.mxu1 %v1943_v53  ;;  %1958 = vmatpush3.bf16.msra.mxu0 %v1943_v53 }
 0x546   : > { %1945 = vmatprep.subr.bf16.mxu1 %v2220_v0  ;;  %1959 = vmatprep.subr.bf16.mxu0 %v2220_v0 }
 0x547   : > { %v1946_v58 = vpack.c.bf16 %v2067_v56, %v2066_v57 }
 0x548   : > { %v1158_v63 = vpop.permute.xlu0 %1157 }
 0x549   : > { %1947 = vmatpush3.bf16.msra.mxu1 %v1946_v58  ;;  %1961 = vmatpush3.bf16.msra.mxu0 %v1946_v58 }
 0x54a   : > { %1948 = vmatprep.subr.bf16.mxu1 %v2220_v0  ;;  %1962 = vmatprep.subr.bf16.mxu0 %v2220_v0 }
 0x54b   : > { %v2077_v30 = vpop.eup %2076 }
 0x54c   : > { %v1063_v59 = vsel %vm633_vm2, %v2077_v30, 0.0 }
 0x54d   : > { %1064 = vadd.xlane.f32.xlu1 %v1063_v59 }
 0x5da   : > { %v1065_v60 = vpop.xlane.xlu1 %1064 }
 0x5db   : > { %2078 = vrcp.f32 %v1065_v60 }
 0x5e5   : > { %v2079_v61 = vpop.eup %2078 }
 0x5e6   : > { %v1067_v62 = vmul.f32 %v2079_v61, %v2077_v30 }
 0x5e8   : > { %1803 = vmatmul.mubr.msk.f32.vlgmr.msra.gmra.mrb[10].mxu1 %vm633_vm2, %v1067_v62 }
 0x5e9   : > { %1951 = vmatpush3.bf16.xpose.msk.msra.mxu1 %vm2518_vm3, %v1935_v31  ;;  %1813 = vmatprep.mubr.msk.f32.mxu1 %vm2221_vm0, %v2222_v1  ;;  %v1344_v31 = vld [vmem:[%s2775_s5 + $0x58] sm:$0xff] }
 0x5ea   : > { %1952 = vmatprep.subr.bf16.mxu1 %v2220_v0  ;;  %v1978_v32 = vpack.c.bf16 %v1344_v31, %v1343_v29 }
 0x5f1   : > { %1955 = vmatpush3.bf16.xpose.msk.msra.mxu1 %vm2518_vm3, %v1939_v36  ;;  %v1981_v36 = vpack.c.bf16 %v1346_v35, %v1345_v33 }
 0x5f8   : > { %1814 = vmatmul.mubr.msk.f32.vlgmr.msra.gmra.mrb[12].mxu1 %vm633_vm2, %v1158_v63 }
 0x6bb   : > { %v1153_v2 = vpop.f32.mrb[10].mxu1 }
 0x6bc   : > { %v1804_v3 = vpop.f32.mrb[11].mxu1 }
 0x6cb   : > { %v1227_v4 = vpop.f32.mrb[12].mxu1 }
 0x6cc   : > { %v1231_v5 = vmul.f32 0.17677669, %v1227_v4  ;;  %v1815_v6 = vpop.f32.mrb[13].mxu1 }
 0x6ce   : > { %v1232_v7 = vadd.f32 %v1231_v5, %v2589_v55  ;;  %v1333_v55 = vld [vmem:[%s2775_s5] sm:$0xff] }
 0x6cf   : > { %v1963_v18 = vpack.c.bf16 %v1334_v16, %v1333_v55 }
 0x6d0   : > { %v1233_v8 = vsel %vm633_vm2, %v1232_v7, -inf }
 0x6d1   : > { %1234 = vmax.xlane.f32.xlu0 %v1233_v8 }
 0x75e   : > { %v1235_v9 = vpop.xlane.xlu0 %1234 }
 0x75f   : > { %v1236_v10 = vsub.f32 %v1232_v7, %v1235_v9 }
 0x761   : > { %v1237_v11 = vmul.f32 1.442695, %v1236_v10 }
 0x763   : > { %2080 = vpow2.f32 %v1237_v11 }
 0x76d   : > { %v2081_v12 = vpop.eup %2080 }
 0x76e   : > { %v1239_v34 = vsel %vm633_vm2, %v2081_v12, 0.0 }
 0x76f   : > { %1240 = vadd.xlane.f32.xlu1 %v1239_v34 }
 0x780   : > { %1318 = vrot.lane.b32.xlu1 %v961_v40, %s2225_s17  ;;  %v1984_v40 = vpack.c.bf16 %v1348_v39, %v1347_v37 }
 0x784   : > { %1322 = vrot.lane.b32.xlu1 %v1153_v2, %s2224_s22  ;;  %s1434_s22 = sshll.u32 %s346_s0, 4  ;;  %s2727_s22 = int_to_ptr.vmem [resolvable:$true] %s1434_s22 }
 0x785   : > { %s2144_s23 = scalar_lea.vmem %s2727_s22, 128  ;;  %p2151_p9 = scmp.lt.s32.totalorder %s2727_s22, %s2149_s19 }
 0x786   : > { %p2145_p3 = scmp.ne.s32.totalorder %s2727_s22, %s2144_s23  ;;  %p2152_p0 = scmp.lt.s32.totalorder %s2150_s21, %s2144_s23 }
 0x788   : > { %p2146_p10 = pnand %p2145_p3, %p2793_p7  ;;  %p2153_p1 = por %p2152_p0, %p2151_p9 }
 0x78a   : > { %p2147_p8 = pneg %p2146_p10 }
 0x78c   : > { %p2154_p11 = pnand %p2153_p1, %p2147_p8 }
 0x7fc   : > { %v1241_v13 = vpop.xlane.xlu1 %1240 }
 0x7fd   : > { %2082 = vrcp.f32 %v1241_v13 }
 0x800   : > { %v1319_v43 = vpop.permute.xlu1 %1318 }
 0x801   : > { %v1329_v45 = vsel %vm633_vm2, %v2630_v38, %v1319_v43 }
 0x804   : > { %v1323_v44 = vpop.permute.xlu1 %1322 }
 0x805   : > { %v1330_v46 = vsel %vm363_vm1, %v1329_v45, %v1323_v44 }
 0x807   : > { %v2083_v14 = vpop.eup %2082 }
 0x808   : > { %v1243_v15 = vmul.f32 %v2083_v14, %v2081_v12 }
 0x80a   : > { %1825 = vmatmul.mubr.msk.f32.vlgmr.msra.gmra.mrb[10].mxu0 %vm633_vm2, %v1243_v15 }
 0x80b   : > { %1859 = vmatprep.mubr.msk.f32.mxu0 %vm2221_vm0, %v2222_v1  ;;  %1964 = vmatpush3.bf16.msra.mxu0 %v1963_v18  ;;  %v1337_v1 = vld [vmem:[%s2775_s5 + $0x20] sm:$0xff] }
 0x80c   : > { %1965 = vmatprep.subr.bf16.mxu0 %v2220_v0  ;;  %v1969_v22 = vpack.c.bf16 %v1338_v21, %v1337_v1 }
 0x80f   : > { %1967 = vmatpush3.bf16.msra.mxu0 %v1966_v20 }
 0x810   : > { %1968 = vmatprep.subr.bf16.mxu0 %v2220_v0 }
 0x813   : > { %1970 = vmatpush3.bf16.msra.mxu0 %v1969_v22 }
 0x814   : > { %1971 = vmatprep.subr.bf16.mxu0 %v2220_v0 }
 0x817   : > { %1973 = vmatpush3.bf16.msra.mxu0 %v1972_v25 }
 0x818   : > { %1974 = vmatprep.subr.bf16.mxu0 %v2220_v0 }
 0x81b   : > { %1976 = vmatpush3.bf16.msra.mxu0 %v1975_v28 }
 0x81c   : > { %1977 = vmatprep.subr.bf16.mxu0 %v2220_v0 }
 0x81f   : > { %1979 = vmatpush3.bf16.msra.mxu0 %v1978_v32 }
 0x820   : > { %1980 = vmatprep.subr.bf16.mxu0 %v2220_v0 }
 0x823   : > { %1982 = vmatpush3.bf16.msra.mxu0 %v1981_v36 }
 0x824   : > { %1983 = vmatprep.subr.bf16.mxu0 %v2220_v0 }
 0x827   : > { %1985 = vmatpush3.bf16.msra.mxu0 %v1984_v40 }
 0x8dd   : > { %v1313_v41 = vpop.f32.mrb[10].mxu0 }
 0x8de   : > { %1326 = vrot.lane.b32.xlu1 %v1313_v41, %s2223_s15  ;;  %v1826_v42 = vpop.f32.mrb[11].mxu0 }
 0x950   : > { %v1327_v47 = vpop.permute.xlu1 %1326 }
 0x951   : > { %v1332_v48 = vsel %vm1331_vm4, %v1330_v46, %v1327_v47 }
 0x952   : > { %1860 = vmatmul.mubr.f32.vlgmr.msra.gmra.mrb[12].mxu0 %v1332_v48 }
 0xa25   : > { %v1415_v0 = vpop.f32.mrb[12].mxu0 }
 0xa26   : > { %1419 = vst.msk [vmem:[%s346_s0] sm:$0xff] %vm363_vm1, %v1415_v0  ;;  %v1861_v38 = vpop.f32.mrb[13].mxu0 }
 0xa27   : > { %2157 = shalt.err (!%p2154_p11)
}
 0xa28   : > { %s2158_s18 = scalar_lea.hbm %s2725_s16, 128  ;;  %s2162_s9 = scalar_lea.hbm %s2777_s7, 256 }
 0xa29   : > { %p2159_p12 = scmp.ne.s32.totalorder %s2725_s16, %s2158_s18  ;;  %p2163_p5 = scmp.lt.u32.totalorder %s2725_s16, %s2777_s7 }
 0xa2a   : > { %p2164_p6 = scmp.lt.u32.totalorder %s2162_s9, %s2158_s18  ;;  %p2166_p3 = scmp.lt.u32.totalorder %s2158_s18, %s2725_s16 }
 0xa2b   : > { %p2160_p2 = pnand %p2159_p12, %p2793_p7 }
 0xa2c   : > { %p2165_p13 = por %p2164_p6, %p2163_p5 }
 0xa2d   : > { %p2161_p4 = pneg %p2160_p2 }
 0xa2e   : > { %p2167_p10 = por %p2166_p3, %p2165_p13 }
 0xa30   : > { %p2168_p8 = pnand %p2167_p10, %p2161_p4 }
 0xa32   : > { %2171 = shalt.err (!%p2168_p8)
}
 0xa33   : > { %1993 = dma.vmem_to_hbm [thread:$0]  (%p2793_p7), %s2727_s22, 128, %s2725_s16, %s1421_s8  }
 0xa34 PF: > { %s1446_s0 = sand.u32 1, %s2202_s24   ;;  %p2794_p9 = scmp.ne.s32.totalorder %s2784_s14, 0 }
 0xa35   : > { %p2795_p0 = scmp.ge.s32.totalorder %s2214_s27, 2  ;;  %s1447_s17 = scalar_lea.sflag [#allocation4], %s1446_s0 }
 0xa37   : > { %p2003_p1 = pnand %p2795_p0, %p2794_p9 }
 0xa39   : > { %2197 = dma.done.wait (!%p2003_p1), %s1447_s17, 128  }
 0xa3a   : > { %2199 = vsyncadd (!%p2003_p1), %s1447_s17, 4294967168  ;;  %p23_p11 = scmp.ge.s32.totalorder %s2292_s30, 4   ;;  %s2796_s24 = smov %s2206_s25 }
 0xa3b   : > { %s2797_s25 = smov %s2210_s26  ;;  %s2798_s26 = smov %s2304_s10 }
 0xa3c   : > { %s2799_s27 = smov %s2292_s30  ;;  %25 = sbr.rel (!%p23_p11) target bundleno = 9 (0x9), region = 109 }
 0xa43   :  { %1452 = vsyncpa [#allocation3], 1 }
 0xa44   :  { %1454 = vsyncpa [#allocation3 + $0x1], 1 }
 0xa45   :  { %1455 = vsyncpa [#allocation6], 1 }
 0xa46   :  { %1457 = vsyncpa [#allocation6 + $0x1], 1 }
 0xa47   :  { %1458 = vsyncpa [#allocation4], 1 }
 0xa48   :  { %1460 = vsyncpa [#allocation4 + $0x1], 1 }

</bundles_post_ra>
